<compile_context>
chip_gen: v7x
topology: tpu7x:2x2x1
jax: 0.10.0
libtpu: 0.0.40
codegen_flags: <defaults>
</compile_context>

<pallas_src>
import functools

import numpy as np
import jax
import jax.numpy as jnp
from jax import lax
from jax.experimental import pallas as pl
from jax.experimental.pallas import tpu as pltpu


def _roundup(x, m):
    return ((int(x) + m - 1) // m) * m


# ----------------------------------------------------------------------------
# Fused loss kernel.
#   grid = (G,)  with G in {1, 2}; each step handles Bblk batch items.
#   cls_ref : VMEM (Bblk, 24, CLSPAD)
#             rows  0..7  : target-class ("picked") logits (segments in 0..3)
#             rows  8..15 : other-class logits            (segments in 8..11)
#             rows 16..23 : per-lane CE weights 1/count   (segments in 16..19)
#             segment order: (pos/grp0, neg/grp0, pos/grp1, neg/grp1)
#   reg_ref : VMEM (Bblk, 32, REGPAD)
#             rows 0..6 pred, 8..14 anchor, 16..22 ref box, 24 weight
#             (anchor / ref-box pad columns and spare rows are 1.0, weights 0)
#   out_ref : VMEM (Bblk, 8, 128)  per-item total loss broadcast over the tile
# ----------------------------------------------------------------------------
def _make_fused_loss_kernel(gain):
    gain = float(gain)

    def kernel(cls_ref, reg_ref, out_ref):
        # ---------------- classification: 4 fused CE(mean) segments ----------
        x = cls_ref[...]                       # (Bblk, 24, CLSPAD)
        picked = x[:, 0:8, :]
        other = x[:, 8:16, :]
        wcls = x[:, 16:24, :]
        t = other - picked
        # stable binary CE: lse - picked = softplus(other - picked)
        ce = jnp.maximum(t, 0.0) + jnp.log(1.0 + jnp.exp(-jnp.abs(t)))
        class_loss = jnp.sum(jnp.sum(ce * wcls, axis=2, keepdims=True),
                             axis=1, keepdims=True)          # (Bblk, 1, 1)

        # -------- regression: anchor-offset encoding + SmoothL1, all boxes ----
        r = reg_ref[...]                       # (Bblk, 32, REGPAD)
        pred = r[:, 0:8, :]                    # row 7 is zero padding
        anc = r[:, 8:16, :]                    # spare row / pad columns are 1.0
        refb = r[:, 16:24, :]                  # spare row / pad columns are 1.0
        w = r[:, 24:25, :]                     # 1/(N_i*2*7) per column, 0 = pad

        row = lax.broadcasted_iota(jnp.int32, pred.shape, 1)
        diff = refb - anc
        inv_diag = lax.rsqrt(anc[:, 3:4, :] * anc[:, 3:4, :] +
                             anc[:, 4:5, :] * anc[:, 4:5, :])
        inv_h = 1.0 / anc[:, 5:6, :]           # exact; pad columns are 1.0
        is_log = (row >= 3) & (row < 6)
        # guarded division: only w/h/d rows feed the log (no inf/NaN created)
        logpart = jnp.log(jnp.where(is_log, refb, 1.0) /
                          jnp.where(is_log, anc, 1.0))
        # atan2(sin d, cos d)-equivalent wrap into [-pi, pi)
        # (differs from atan2 only exactly at the +pi boundary)
        two_pi = 2.0 * np.pi
        wrapped = diff - two_pi * jnp.floor((diff + np.pi) / two_pi)
        target = jnp.where(row < 2, diff * inv_diag,
                 jnp.where(row == 2, diff * inv_h,
                 jnp.where(is_log, logpart, wrapped)))
        d = pred - target
        ad = jnp.abs(d)
        sl1 = jnp.where(ad < 1.0, 0.5 * d * d, ad - 0.5)      # SmoothL1, beta=1
        reg_loss = jnp.sum(jnp.sum(sl1 * w, axis=2, keepdims=True),
                           axis=1, keepdims=True)             # (Bblk, 1, 1)

        total = class_loss + gain * reg_loss                  # (Bblk, 1, 1)
        out_ref[...] = jnp.broadcast_to(total, out_ref.shape).astype(out_ref.dtype)

    return kernel


@functools.lru_cache(maxsize=None)
def _get_fused_loss_call(Btot, Bblk, G, clspad, regpad, gain):
    kernel = _make_fused_loss_kernel(gain)
    grid_spec = pltpu.PrefetchScalarGridSpec(
        num_scalar_prefetch=0,
        grid=(G,),
        in_specs=[
            pl.BlockSpec((Bblk, 24, clspad), lambda g: (g, 0, 0)),   # cls slab
            pl.BlockSpec((Bblk, 32, regpad), lambda g: (g, 0, 0)),   # reg slab
        ],
        out_specs=pl.BlockSpec((Bblk, 8, 128), lambda g: (g, 0, 0)),
    )
    fn = pl.pallas_call(
        kernel,
        out_shape=jax.ShapeDtypeStruct((Btot, 8, 128), jnp.float32),
        grid_spec=grid_spec,
        compiler_params=pltpu.CompilerParams(
            dimension_semantics=("parallel",)),   # 2nd TC on v7x; no-op on v5e/v6e
    )
    return jax.jit(fn)


# ----------------------------------------------------------------------------
# Numpy re-computation of the kernel math (exact transcendentals) used as a
# correctness cross-check of the Pallas lowering in __main__.
# ----------------------------------------------------------------------------
def _reference_total_loss_np(cls_b, reg_b, gain):
    picked = cls_b[0:8].astype(np.float64)
    other = cls_b[8:16].astype(np.float64)
    wcls = cls_b[16:24].astype(np.float64)
    t = other - picked
    ce = np.maximum(t, 0.0) + np.log(1.0 + np.exp(-np.abs(t)))
    class_loss = float(np.sum(ce * wcls))

    pred = reg_b[0:8].astype(np.float64)
    anc = reg_b[8:16].astype(np.float64)
    refb = reg_b[16:24].astype(np.float64)
    w = reg_b[24:25].astype(np.float64)
    row = np.arange(8)[:, None]
    diff = refb - anc
    inv_diag = 1.0 / np.sqrt(anc[3:4] ** 2 + anc[4:5] ** 2)
    is_log = (row >= 3) & (row < 6)
    logpart = np.log(np.where(is_log, refb, 1.0) / np.where(is_log, anc, 1.0))
    two_pi = 2.0 * np.pi
    wrapped = diff - two_pi * np.floor((diff + np.pi) / two_pi)
    target = np.where(row < 2, diff * inv_diag,
             np.where(row == 2, diff / anc[5:6],
             np.where(is_log, logpart, wrapped)))
    d = pred - target
    ad = np.abs(d)
    sl1 = np.where(ad < 1.0, 0.5 * d * d, ad - 0.5)
    reg_loss = float(np.sum(sl1 * w))
    return class_loss + float(gain) * reg_loss


# ----------------------------------------------------------------------------
# Deterministic stand-in for AnchorBoundingBoxFeature (class not provided):
# 2 anchors x 7 params (x, y, z, w, l, h, theta) at every reduced grid cell.
# ----------------------------------------------------------------------------
def _make_anchor_set(config):
    rs = config['anchor_bbox_feature']['reduced_scale']
    x_scale = int(config['voxel_length'] / (config['lidar_x_max'] - config['lidar_x_min']))
    y_scale = int(config['voxel_width'] / (config['lidar_y_max'] - config['lidar_y_min']))
    H = config['voxel_length'] // rs
    W = config['voxel_width'] // rs
    xs = (np.arange(H, dtype=np.float32) * rs + 0.5 * rs) / x_scale + config['lidar_x_min']
    ys = (np.arange(W, dtype=np.float32) * rs + 0.5 * rs) / y_scale + config['lidar_y_min']
    cx = np.broadcast_to(xs[:, None], (H, W)).astype(np.float32)
    cy = np.broadcast_to(ys[None, :], (H, W)).astype(np.float32)
    anchors = []
    for theta in (0.0, np.pi / 2.0):
        ch = np.stack([cx, cy,
                       np.full((H, W), 0.5, np.float32),
                       np.full((H, W), 1.6, np.float32),
                       np.full((H, W), 3.9, np.float32),
                       np.full((H, W), 1.5, np.float32),
                       np.full((H, W), theta, np.float32)], axis=0)
        anchors.append(ch)
    return np.concatenate(anchors, axis=0)   # (14, H, W)


# ----------------------------------------------------------------------------
# LossTotal port
# ----------------------------------------------------------------------------
class LossTotalPallas:
    def __init__(self, config):
        self.config = config
        anchor_set = _make_anchor_set(config)                         # (14,H,W)
        s = anchor_set.shape
        self.anchor_set_np = anchor_set.reshape(2, s[0] // 2, s[1], s[2])  # (2,7,H,W)
        self.regress_type = config['regress_type']
        self.gain = float(config['regress_loss_gain'])
        self._last_host_inputs = None
        self._last_losses = None

    def forward(self, reference_bboxes_batch, num_ref_bbox_batch,
                predicted_class_feature_batch, predicted_regress_feature_batch):
        ref_np = np.asarray(reference_bboxes_batch, np.float32)
        num_np = np.asarray(num_ref_bbox_batch)
        pcf_np = np.asarray(predicted_class_feature_batch, np.float32)
        prf_np = np.asarray(predicted_regress_feature_batch, np.float32)
        B, max_num, _ = ref_np.shape
        if B == 0:
            return jnp.zeros((1,), jnp.float32)

        clspad = _roundup(max(self.config['pos_sample_threshold'],
                              self.config['neg_sample_threshold'] + 1, 1), 128)
        pr = int(self.config['positive_range'])
        regpad = _roundup(max(1, max_num * pr * pr * 2), 128)

        # <=2 grid steps: 2-way split only matters for v7x's two TensorCores.
        G = 2 if B > 1 else 1
        Bblk = -(-B // G)
        Btot = G * Bblk

        cls_all = np.zeros((Btot, 24, clspad), np.float32)
        reg_all = np.zeros((Btot, 32, regpad), np.float32)
        reg_all[:, 8:24, :] = 1.0        # anchor / ref-box pad: no log(0)/div0

        # TODO(synk): positive/negative position mining is data-dependent Python
        # + np.random control flow (as in the reference) and stays on the host.
        for b in range(B):
            reference_bboxes = ref_np[b, :int(num_np[b])]
            IDX, pos_all, pos_list = self.getPositionOfPositive(
                self.anchor_set_np, reference_bboxes,
                sample_threshold=self.config['pos_sample_threshold'])
            neg_list = self.getPositionOfNegative(
                self.anchor_set_np, pos_list,
                sample_threshold=self.config['neg_sample_threshold'])
            self._fill_class(cls_all[b], pos_list, neg_list, pcf_np[b], clspad)
            self._fill_reg(reg_all[b], IDX, pos_all, reference_bboxes, prf_np[b])

        loss_fn = _get_fused_loss_call(Btot, Bblk, G, clspad, regpad, self.gain)
        losses = loss_fn(cls_all, reg_all)          # (Btot, 8, 128)

        self._last_host_inputs = (cls_all, reg_all)
        self._last_losses = losses
        # NOTE: the reference implementation OVERWRITES total_loss each batch
        # iteration; faithfully return the last batch item's loss, shape (1,).
        # (All per-item losses are still produced in the single fused call and
        # consumed by the cross-check below.)
        return losses[B - 1, 0, 0].reshape(1)

    # ----- host-side gather / padding (numpy only, one upload per forward) -----
    def _fill_class(self, cls_b, pos_list, neg_list, pcf, clspad):
        n_pos = len(pos_list)
        n_neg = len(neg_list)
        assert n_pos <= clspad and n_neg <= clspad, "increase classification padding"
        if n_pos > 0:
            pos = np.asarray(pos_list, np.int64)
            pg = pcf[:, pos[:, 0], pos[:, 1]]                 # (4, n_pos)
            # segment 0 (pos/grp0, label 1): picked=ch1, other=ch0
            cls_b[0, :n_pos] = pg[1]; cls_b[8, :n_pos] = pg[0]
            # segment 2 (pos/grp1, label 1): picked=ch3, other=ch2
            cls_b[2, :n_pos] = pg[3]; cls_b[10, :n_pos] = pg[2]
            cls_b[16, :n_pos] = 1.0 / n_pos
            cls_b[18, :n_pos] = 1.0 / n_pos
        neg = np.asarray(neg_list, np.int64)
        ng = pcf[:, neg[:, 0], neg[:, 1]]                     # (4, n_neg)
        # segment 1 (neg/grp0, label 0): picked=ch0, other=ch1
        cls_b[1, :n_neg] = ng[0]; cls_b[9, :n_neg] = ng[1]
        # segment 3 (neg/grp1, label 0): picked=ch2, other=ch3
        cls_b[3, :n_neg] = ng[2]; cls_b[11, :n_neg] = ng[3]
        cls_b[17, :n_neg] = 1.0 / n_neg
        cls_b[19, :n_neg] = 1.0 / n_neg

    def _fill_reg(self, reg_b, IDX, pos_all, reference_bboxes, prf):
        col = 0
        regpad = reg_b.shape[1]
        for idx, ref_box in enumerate(reference_bboxes):
            ids = IDX[idx]
            if len(ids) == 0:
                continue
            pp = np.asarray(pos_all[ids], np.int64)                      # (Ni, 2)
            Ni = pp.shape[0]
            # (14, Ni) -> (Ni, 14) -> (2*Ni, 7): row 2i = anchor0, 2i+1 = anchor1
            pb = prf[:, pp[:, 0], pp[:, 1]].T.reshape(Ni * 2, 7).T       # (7, 2Ni)
            ab = self.anchor_set_np[:, :, pp[:, 0], pp[:, 1]]            # (2,7,Ni)
            ab = np.transpose(ab, (2, 0, 1)).reshape(Ni * 2, 7).T        # (7, 2Ni)
            n = 2 * Ni
            assert col + n <= regpad, "increase regression padding"
            reg_b[0:7, col:col + n] = pb
            reg_b[8:15, col:col + n] = ab
            reg_b[16:23, col:col + n] = np.asarray(ref_box, np.float32)[:, None]
            reg_b[24, col:col + n] = 1.0 / (Ni * 2 * 7)   # mask + 1/(N*2*7)
            col += n

    # ----- host-side position mining (data-dependent Python control flow) -----
    def getPositionOfPositive(self, anchor_bbox_feature, ref_bboxes, sample_threshold=128):
        _, C, H, W = anchor_bbox_feature.shape
        positive_position_list = []
        positive_position_regress = []
        positive_position_idx = {}
        temp_cnt = 0
        for i, ref_bbox in enumerate(ref_bboxes):
            positive_position_idx[i] = []
            x_scale = int(self.config['voxel_length'] /
                          (self.config['lidar_x_max'] - self.config['lidar_x_min']))
            y_scale = int(self.config['voxel_width'] /
                          (self.config['lidar_y_max'] - self.config['lidar_y_min']))
            x_offset = int(-self.config['lidar_x_min'] * x_scale)
            y_offset = int(-self.config['lidar_y_min'] * y_scale)
            reduced_scale = self.config['anchor_bbox_feature']['reduced_scale']
            point_x = int((ref_bbox[0] * x_scale + x_offset) / reduced_scale)
            point_y = int((ref_bbox[1] * y_scale + y_offset) / reduced_scale)
            if point_x < 0 or point_x > H - 1 or point_y < 0 or point_y > W - 1:
                continue
            for x_int in range(self.config['positive_range']):
                pos_x = point_x - int(self.config['positive_range'] / 2) + x_int
                for y_int in range(self.config['positive_range']):
                    pos_y = point_y - int(self.config['positive_range'] / 2) + y_int
                    if pos_x < 0 or pos_x > H - 1 or pos_y < 0 or pos_y > W - 1:
                        continue
                    positive_position_list.append([pos_x, pos_y])
                    if self.regress_type == 0:
                        positive_position_regress.append([pos_x, pos_y])
                        positive_position_idx[i].append(temp_cnt)
                        temp_cnt += 1
                    elif pos_x == point_x and pos_y == point_y:
                        positive_position_regress.append([pos_x, pos_y])
                        positive_position_idx[i].append(temp_cnt)
                        temp_cnt += 1
        np.random.shuffle(positive_position_list)
        if len(positive_position_list) > sample_threshold:
            positive_position_list = positive_position_list[:sample_threshold]
        return positive_position_idx, np.array(positive_position_regress), positive_position_list

    def getPositionOfNegative(self, anchor_bbox_feature, positive_position_list, sample_threshold=128):
        _, C, H, W = anchor_bbox_feature.shape
        # set-based membership test: same np.random draw sequence as the
        # original list-membership loop, just O(1) per check.
        pos_set = {(int(p[0]), int(p[1])) for p in positive_position_list}
        negative_position_list = []
        sample = 0
        while 1:
            x = np.random.randint(H)
            y = np.random.randint(W)
            if (x, y) in pos_set:
                continue
            negative_position_list.append([x, y])
            sample += 1
            if sample > sample_threshold:
                break
        return negative_position_list


# ----------------------------------------------------------------------------
if __name__ == "__main__":
    np.random.seed(0)   # deterministic positive shuffle / negative sampling
    config = {
        'voxel_length': 32, 'voxel_width': 32,
        'lidar_x_min': -16.0, 'lidar_x_max': 16.0,
        'lidar_y_min': -16.0, 'lidar_y_max': 16.0,
        'anchor_bbox_feature': {'reduced_scale': 2},
        'positive_range': 3,
        'pos_sample_threshold': 32,
        'neg_sample_threshold': 32,
        'regress_type': 0,
        'regress_loss_gain': 2.0,
    }
    H = config['voxel_length'] // config['anchor_bbox_feature']['reduced_scale']
    W = config['voxel_width'] // config['anchor_bbox_feature']['reduced_scale']
    B, max_num = 2, 3

    key = jax.random.PRNGKey(0)
    k1, k2, k3, k4, k5 = jax.random.split(key, 5)
    xy = jax.random.uniform(k1, (B, max_num, 2), minval=-12.0, maxval=12.0)
    z = jax.random.uniform(k2, (B, max_num, 1), minval=0.0, maxval=1.0)
    whd = jax.random.uniform(k3, (B, max_num, 3), minval=1.0, maxval=4.0)
    theta = jax.random.uniform(k4, (B, max_num, 1), minval=-np.pi, maxval=np.pi)
    reference_bboxes_batch = jnp.concatenate([xy, z, whd, theta], axis=-1)   # (B, 3, 7)
    num_ref_bbox_batch = jnp.array([3, 2], jnp.int32)

    kc, kr = jax.random.split(k5)
    predicted_class_feature_batch = jax.random.normal(kc, (B, 4, H, W), jnp.float32)
    predicted_regress_feature_batch = jax.random.normal(kr, (B, 14, H, W), jnp.float32)

    model = LossTotalPallas(config)
    out = model.forward(reference_bboxes_batch, num_ref_bbox_batch,
                        predicted_class_feature_batch, predicted_regress_feature_batch)
    out = jax.block_until_ready(out)
    assert out.shape == (1,) and bool(jnp.isfinite(out[0]))

    # Cross-check the Pallas kernel against a numpy re-computation of the same
    # math (exact weights / divisions; only HW transcendental error remains).
    cls_all, reg_all = model._last_host_inputs
    got = np.asarray(model._last_losses)[:B, 0, 0]
    ref = np.array([_reference_total_loss_np(cls_all[b], reg_all[b],
                                             config['regress_loss_gain'])
                    for b in range(B)])
    assert np.all(np.isfinite(got))
    assert np.allclose(got, ref, rtol=2e-3, atol=1e-3), (got, ref)

    print("KERNEL_OK")
</pallas_src>

<mosaic_0001>
module attributes {stable_mosaic.version = 11 : i64} {
  func.func @kernel(%arg0: i32, %arg1: memref<1x24x128xf32, #tpu.memory_space<vmem>>, %arg2: memref<1x32x128xf32, #tpu.memory_space<vmem>>, %arg3: memref<1x8x128xf32, #tpu.memory_space<vmem>>) attributes {dimension_semantics = [#tpu.dimension_semantics<parallel>], iteration_bounds = array<i64: 2>, scalar_prefetch = 0 : i64, scratch_operands = 0 : i64, tpu.core_type = #tpu.core_type<tc>, window_params = [{transform_indices = @transform_0, window_bounds = array<i64: 1, 24, 128>}, {transform_indices = @transform_1, window_bounds = array<i64: 1, 32, 128>}, {transform_indices = @transform_2, window_bounds = array<i64: 1, 8, 128>}]} {
    %c0 = arith.constant 0 : index
    %c0_0 = arith.constant 0 : index
    %c0_1 = arith.constant 0 : index
    %0 = vector.load %arg1[%c0, %c0_0, %c0_1] : memref<1x24x128xf32, #tpu.memory_space<vmem>>, vector<1x24x128xf32>
    %1 = vector.extract_strided_slice %0 {offsets = [0, 0, 0], sizes = [1, 8, 128], strides = [1, 1, 1]} : vector<1x24x128xf32> to vector<1x8x128xf32>
    %2 = vector.extract_strided_slice %0 {offsets = [0, 8, 0], sizes = [1, 8, 128], strides = [1, 1, 1]} : vector<1x24x128xf32> to vector<1x8x128xf32>
    %3 = vector.extract_strided_slice %0 {offsets = [0, 16, 0], sizes = [1, 8, 128], strides = [1, 1, 1]} : vector<1x24x128xf32> to vector<1x8x128xf32>
    %4 = arith.subf %2, %1 : vector<1x8x128xf32>
    %cst = arith.constant 0.000000e+00 : f32
    %5 = vector.broadcast %cst : f32 to vector<1x8x128xf32>
    %6 = arith.maximumf %4, %5 : vector<1x8x128xf32>
    %7 = math.absf %4 : vector<1x8x128xf32>
    %cst_2 = arith.constant 0.000000e+00 : f32
    %8 = vector.broadcast %cst_2 : f32 to vector<1x8x128xf32>
    %9 = arith.subf %8, %7 : vector<1x8x128xf32>
    %10 = math.exp %9 : vector<1x8x128xf32>
    %cst_3 = arith.constant 1.000000e+00 : f32
    %11 = vector.broadcast %cst_3 : f32 to vector<1x8x128xf32>
    %12 = arith.addf %11, %10 : vector<1x8x128xf32>
    %13 = math.log %12 : vector<1x8x128xf32>
    %14 = arith.addf %6, %13 : vector<1x8x128xf32>
    %15 = arith.mulf %14, %3 : vector<1x8x128xf32>
    %cst_4 = arith.constant dense<0.000000e+00> : vector<1x8xf32>
    %16 = vector.multi_reduction <add>, %15, %cst_4 [2] : vector<1x8x128xf32> to vector<1x8xf32>
    %17 = vector.shape_cast %16 : vector<1x8xf32> to vector<1x8x1xf32>
    %cst_5 = arith.constant dense<0.000000e+00> : vector<1x1xf32>
    %18 = vector.multi_reduction <add>, %17, %cst_5 [1] : vector<1x8x1xf32> to vector<1x1xf32>
    %19 = vector.shape_cast %18 : vector<1x1xf32> to vector<1x1x1xf32>
    %c0_6 = arith.constant 0 : index
    %c0_7 = arith.constant 0 : index
    %c0_8 = arith.constant 0 : index
    %20 = vector.load %arg2[%c0_6, %c0_7, %c0_8] : memref<1x32x128xf32, #tpu.memory_space<vmem>>, vector<1x32x128xf32>
    %21 = vector.extract_strided_slice %20 {offsets = [0, 0, 0], sizes = [1, 8, 128], strides = [1, 1, 1]} : vector<1x32x128xf32> to vector<1x8x128xf32>
    %22 = vector.extract_strided_slice %20 {offsets = [0, 8, 0], sizes = [1, 8, 128], strides = [1, 1, 1]} : vector<1x32x128xf32> to vector<1x8x128xf32>
    %23 = vector.extract_strided_slice %20 {offsets = [0, 16, 0], sizes = [1, 8, 128], strides = [1, 1, 1]} : vector<1x32x128xf32> to vector<1x8x128xf32>
    %24 = vector.extract_strided_slice %20 {offsets = [0, 24, 0], sizes = [1, 1, 128], strides = [1, 1, 1]} : vector<1x32x128xf32> to vector<1x1x128xf32>
    %25 = tpu.iota {dimensions = array<i32: 1>} : vector<1x8x128xi32>
    %26 = arith.subf %23, %22 : vector<1x8x128xf32>
    %27 = vector.extract_strided_slice %22 {offsets = [0, 3, 0], sizes = [1, 1, 128], strides = [1, 1, 1]} : vector<1x8x128xf32> to vector<1x1x128xf32>
    %28 = vector.extract_strided_slice %22 {offsets = [0, 3, 0], sizes = [1, 1, 128], strides = [1, 1, 1]} : vector<1x8x128xf32> to vector<1x1x128xf32>
    %29 = arith.mulf %27, %28 : vector<1x1x128xf32>
    %30 = vector.extract_strided_slice %22 {offsets = [0, 4, 0], sizes = [1, 1, 128], strides = [1, 1, 1]} : vector<1x8x128xf32> to vector<1x1x128xf32>
    %31 = vector.extract_strided_slice %22 {offsets = [0, 4, 0], sizes = [1, 1, 128], strides = [1, 1, 1]} : vector<1x8x128xf32> to vector<1x1x128xf32>
    %32 = arith.mulf %30, %31 : vector<1x1x128xf32>
    %33 = arith.addf %29, %32 : vector<1x1x128xf32>
    %34 = math.rsqrt %33 : vector<1x1x128xf32>
    %35 = vector.extract_strided_slice %22 {offsets = [0, 5, 0], sizes = [1, 1, 128], strides = [1, 1, 1]} : vector<1x8x128xf32> to vector<1x1x128xf32>
    %cst_9 = arith.constant 1.000000e+00 : f32
    %36 = vector.broadcast %cst_9 : f32 to vector<1x1x128xf32>
    %37 = arith.divf %36, %35 : vector<1x1x128xf32>
    %c3_i32 = arith.constant 3 : i32
    %38 = vector.broadcast %c3_i32 : i32 to vector<1x8x128xi32>
    %39 = arith.cmpi sge, %25, %38 : vector<1x8x128xi32>
    %c6_i32 = arith.constant 6 : i32
    %40 = vector.broadcast %c6_i32 : i32 to vector<1x8x128xi32>
    %41 = arith.cmpi slt, %25, %40 : vector<1x8x128xi32>
    %42 = arith.andi %39, %41 : vector<1x8x128xi1>
    %cst_10 = arith.constant 1.000000e+00 : f32
    %43 = vector.broadcast %cst_10 : f32 to vector<1x8x128xf32>
    %44 = arith.select %42, %23, %43 : vector<1x8x128xi1>, vector<1x8x128xf32>
    %cst_11 = arith.constant 1.000000e+00 : f32
    %45 = vector.broadcast %cst_11 : f32 to vector<1x8x128xf32>
    %46 = arith.select %42, %22, %45 : vector<1x8x128xi1>, vector<1x8x128xf32>
    %47 = arith.divf %44, %46 : vector<1x8x128xf32>
    %48 = math.log %47 : vector<1x8x128xf32>
    %cst_12 = arith.constant 3.14159274 : f32
    %49 = vector.broadcast %cst_12 : f32 to vector<1x8x128xf32>
    %50 = arith.addf %26, %49 : vector<1x8x128xf32>
    %cst_13 = arith.constant 6.28318548 : f32
    %51 = vector.broadcast %cst_13 : f32 to vector<1x8x128xf32>
    %52 = arith.divf %50, %51 : vector<1x8x128xf32>
    %53 = math.floor %52 : vector<1x8x128xf32>
    %cst_14 = arith.constant 6.28318548 : f32
    %54 = vector.broadcast %cst_14 : f32 to vector<1x8x128xf32>
    %55 = arith.mulf %54, %53 : vector<1x8x128xf32>
    %56 = arith.subf %26, %55 : vector<1x8x128xf32>
    %c2_i32 = arith.constant 2 : i32
    %57 = vector.broadcast %c2_i32 : i32 to vector<1x8x128xi32>
    %58 = arith.cmpi slt, %25, %57 : vector<1x8x128xi32>
    %59 = vector.broadcast %34 : vector<1x1x128xf32> to vector<1x8x128xf32>
    %60 = arith.mulf %26, %59 : vector<1x8x128xf32>
    %c2_i32_15 = arith.constant 2 : i32
    %61 = vector.broadcast %c2_i32_15 : i32 to vector<1x8x128xi32>
    %62 = arith.cmpi eq, %25, %61 : vector<1x8x128xi32>
    %63 = vector.broadcast %37 : vector<1x1x128xf32> to vector<1x8x128xf32>
    %64 = arith.mulf %26, %63 : vector<1x8x128xf32>
    %65 = arith.select %42, %48, %56 : vector<1x8x128xi1>, vector<1x8x128xf32>
    %66 = arith.select %62, %64, %65 : vector<1x8x128xi1>, vector<1x8x128xf32>
    %67 = arith.select %58, %60, %66 : vector<1x8x128xi1>, vector<1x8x128xf32>
    %68 = arith.subf %21, %67 : vector<1x8x128xf32>
    %69 = math.absf %68 : vector<1x8x128xf32>
    %cst_16 = arith.constant 1.000000e+00 : f32
    %70 = vector.broadcast %cst_16 : f32 to vector<1x8x128xf32>
    %71 = arith.cmpf olt, %69, %70 : vector<1x8x128xf32>
    %cst_17 = arith.constant 5.000000e-01 : f32
    %72 = vector.broadcast %cst_17 : f32 to vector<1x8x128xf32>
    %73 = arith.mulf %72, %68 : vector<1x8x128xf32>
    %74 = arith.mulf %73, %68 : vector<1x8x128xf32>
    %cst_18 = arith.constant 5.000000e-01 : f32
    %75 = vector.broadcast %cst_18 : f32 to vector<1x8x128xf32>
    %76 = arith.subf %69, %75 : vector<1x8x128xf32>
    %77 = arith.select %71, %74, %76 : vector<1x8x128xi1>, vector<1x8x128xf32>
    %78 = vector.broadcast %24 : vector<1x1x128xf32> to vector<1x8x128xf32>
    %79 = arith.mulf %77, %78 : vector<1x8x128xf32>
    %cst_19 = arith.constant dense<0.000000e+00> : vector<1x8xf32>
    %80 = vector.multi_reduction <add>, %79, %cst_19 [2] : vector<1x8x128xf32> to vector<1x8xf32>
    %81 = vector.shape_cast %80 : vector<1x8xf32> to vector<1x8x1xf32>
    %cst_20 = arith.constant dense<0.000000e+00> : vector<1x1xf32>
    %82 = vector.multi_reduction <add>, %81, %cst_20 [1] : vector<1x8x1xf32> to vector<1x1xf32>
    %83 = vector.shape_cast %82 : vector<1x1xf32> to vector<1x1x1xf32>
    %cst_21 = arith.constant 2.000000e+00 : f32
    %84 = vector.broadcast %cst_21 : f32 to vector<1x1x1xf32>
    %85 = arith.mulf %84, %83 : vector<1x1x1xf32>
    %86 = arith.addf %19, %85 : vector<1x1x1xf32>
    %87 = vector.shape_cast %86 : vector<1x1x1xf32> to vector<1x1x1xf32>
    %88 = vector.broadcast %87 : vector<1x1x1xf32> to vector<1x8x128xf32>
    %c0_22 = arith.constant 0 : index
    %c0_23 = arith.constant 0 : index
    %c0_24 = arith.constant 0 : index
    %89 = vector.load %arg3[%c0_22, %c0_23, %c0_24] : memref<1x8x128xf32, #tpu.memory_space<vmem>>, vector<1x8x128xf32>
    tpu.vector_store %arg3[%c0_22, %c0_23, %c0_24], %88 {strides = array<i32>} : memref<1x8x128xf32, #tpu.memory_space<vmem>>, vector<1x8x128xf32>,
    return
  }
  func.func @transform_0(%arg0: i32) -> (i32, i32, i32) {
    %c0_i32 = arith.constant 0 : i32
    %c0_i32_0 = arith.constant 0 : i32
    %c0_i32_1 = arith.constant 0 : i32
    return %arg0, %c0_i32, %c0_i32_0 : i32, i32, i32
  }
  func.func @transform_1(%arg0: i32) -> (i32, i32, i32) {
    %c0_i32 = arith.constant 0 : i32
    %c0_i32_0 = arith.constant 0 : i32
    %c0_i32_1 = arith.constant 0 : i32
    return %arg0, %c0_i32, %c0_i32_0 : i32, i32, i32
  }
  func.func @transform_2(%arg0: i32) -> (i32, i32, i32) {
    %c0_i32 = arith.constant 0 : i32
    %c0_i32_0 = arith.constant 0 : i32
    %c0_i32_1 = arith.constant 0 : i32
    return %arg0, %c0_i32, %c0_i32_0 : i32, i32, i32
  }
}

</mosaic_0001>

<bundles_post_ra>
// kernel: tpu_custom_call.1
= control target key start
LH: loop header
LB: loop body
LE: loop exit
PB: predicated region body
PF: predicated region fallthrough
CT: control target
= control target key end

     0   :  { %7 = vsyncpa [#allocation3], 0  ;;  %s867_s0 = inlined_call_operand.hbm [shape: f32[2,24,128], index: 0, kind: input, shape index: {}]   ;;  %s868_s1 = inlined_call_operand.hbm [shape: f32[2,32,128], index: 1, kind: input, shape index: {}]   ;;  %s869_s2 = inlined_call_operand.hbm [shape: f32[2,8,128], index: 2, kind: output, shape index: {}]  }
   0x1   :  { %9 = vsyncpa [#allocation3 + $0x1], 0 }
   0x2   :  { %10 = vsyncpa [#allocation6], 0 }
   0x3   :  { %12 = vsyncpa [#allocation6 + $0x1], 0 }
   0x4   :  { %13 = vsyncpa [#allocation4], 0 }
   0x5   :  { %15 = vsyncpa [#allocation4 + $0x1], 0  ;;  %s635_s9 = smov 0   ;;  %s637_s10 = smov 0  }
   0x6   :  { %s639_s11 = smov 0   ;;  %s641_s12 = smov 0  }
   0x7 LB: > { %s656_s13 = sadd.s32 4294967295, %s613_s12   ;;  %s399_s14 = sadd.s32 4294967294, %s613_s12   ;;  %s613_s12 = sphi %s641_s12, %s886_s12   ;;  %s609_s11 = sphi %s639_s11, %s885_s11   ;;  %s605_s10 = sphi %s637_s10, %s884_s10   ;;  %s601_s9 = sphi %s635_s9, %s883_s9  }
   0x8   : > { %s660_s15 = sadd.s32 1, %s613_s12   ;;  %s28_s16 = sadd.s32 1, %s609_s11 }
   0x9   : > { %s25_s17 = ssub.s32 %s613_s12, %s660_s15  ;;  %p35_p0 = scmp.ne.s32.totalorder %s609_s11, %s605_s10 }
   0xa   : > { %p26_p1 = scmp.eq.s32.totalorder %s25_s17, 0  ;;  %p36_p2 = scmp.eq.s32.totalorder %s613_s12, 0 }
   0xb   : > { %p41_p3 = scmp.ne.s32.totalorder %s605_s10, %s601_s9  ;;  %p42_p4 = scmp.eq.s32.totalorder %s656_s13, 0 }
   0xc   : > { %s672_s18 = scalar_select %p26_p1, %s609_s11, %s28_s16  }
   0xd   : > { %p37_p5 = por %p36_p2, %p35_p0  ;;  %p674_p6 = por %p42_p4, %p41_p3 }
   0xe   : > { %p91_p7 = scmp.eq.s32.totalorder %s656_s13, 1  ;;  %p97_p8 = scmp.eq.s32.totalorder %s399_s14, 1 }
   0xf   : > { %s872_s19 = scalar_select %p674_p6, 1, 0 }
  0x10   : > { %p435_p10 = scmp.lt.s32.totalorder %s613_s12, 2  ;;  %p681_p11 = por %p91_p7, %p35_p0 }
  0x11   : > { %p685_p12 = por %p97_p8, %p41_p3  ;;  %s690_s22 = sand.u32 1, %s609_s11  }
  0x12   : > { %s873_s20 = scalar_select %p681_p11, 1, 0 }
  0x13   : > { %s874_s21 = scalar_select %p685_p12, 1, 0 }
  0x14   : > { %s416_s23 = smul.u32 384, %s613_s12  ;;  %p699_p13 = pnand %p435_p10, %p37_p5 }
  0x15   : > { %s415_s24 = smul.u32 24, %s690_s22  ;;  %s118_s3 = scalar_lea.sflag [#allocation3], %s690_s22 }
  0x16   : > { %s697_s27 = scalar_lea.hbm %s867_s0, %s416_s23  ;;  %p485_p1 = pneg %p699_p13 }
  0x17   : > { %s121_s29 = scalar_lea.vmem [#allocation2], %s415_s24  ;;  %s483_s4 = scalar_lea.hbm %s697_s27, 384 }
  0x18   : > { %s128_s30 = sshll.u32 %s121_s29, 4  ;;  %p484_p0 = scmp.ne.s32.totalorder %s697_s27, %s483_s4  ;;  %s703_s30 = int_to_ptr.vmem [resolvable:$true] %s128_s30 }
  0x19   : > { %s488_s7 = scalar_lea.hbm %s867_s0, 768  ;;  %p489_p4 = scmp.lt.u32.totalorder %s697_s27, %s867_s0 }
  0x1a   : > { %p486_p2 = pnand %p485_p1, %p484_p0  ;;  %p490_p5 = scmp.lt.u32.totalorder %s488_s7, %s483_s4 }
  0x1b   : > { %p492_p8 = scmp.lt.u32.totalorder %s483_s4, %s697_s27 }
  0x1c   : > { %p487_p3 = pneg %p486_p2  ;;  %p491_p7 = por %p490_p5, %p489_p4 }
  0x1e   : > { %p493_p10 = por %p492_p8, %p491_p7 }
  0x20   : > { %p494_p9 = pnand %p493_p10, %p487_p3 }
  0x22   : > { %497 = shalt.err (!%p494_p9)
}
  0x23   : > { %s498_s16 = scalar_lea.vmem %s703_s30, 384  ;;  %s615_s17 = smov [#allocation2]  }
  0x24   : > { %p499_p0 = scmp.ne.s32.totalorder %s703_s30, %s498_s16  ;;  %s503_s23 = sshll.u32 %s615_s17, 4  ;;  %s504_s23 = int_to_ptr.vmem [resolvable:$false] %s503_s23 }
  0x25   : > { %s505_s24 = scalar_lea.vmem %s504_s23, 768  ;;  %p506_p11 = scmp.lt.s32.totalorder %s703_s30, %s504_s23 }
  0x26   : > { %p501_p2 = pnand %p499_p0, %p485_p1  ;;  %p507_p4 = scmp.lt.s32.totalorder %s505_s24, %s498_s16 }
  0x28   : > { %p502_p12 = pneg %p501_p2  ;;  %p508_p5 = por %p507_p4, %p506_p11 }
  0x2a   : > { %p509_p7 = pnand %p508_p5, %p502_p12 }
  0x2c   : > { %512 = shalt.err (!%p509_p7)
}
  0x2d   : > { %s616_s25 = smov 128   ;;  %s617_s26 = smov 8  }
  0x2e   : > { %427 = dma.hbm_to_vmem [thread:$0]  (!%p699_p13), %s697_s27, 384, %s703_s30, %s118_s3, %s616_s25, %s616_s25, %s617_s26  }
  0x2f   : > { %p406_p9 = scmp.ge.s32.totalorder %s613_s12, 1  ;;  %p157_p11 = scmp.lt.s32.totalorder %s613_s12, 3 }
  0x30   : > { %s403_s29 = sshll.u32 %s690_s22, 5  ;;  %s414_s5 = sshll.u32 %s613_s12, 9 }
  0x31   : > { %p739_p12 = pnand %p406_p9, %p157_p11  ;;  %s142_s6 = scalar_lea.vmem [#allocation5], %s403_s29 }
  0x32   : > { %s149_s7 = sshll.u32 %s142_s6, 4  ;;  %s747_s16 = scalar_lea.hbm %s868_s1, %s414_s5  ;;  %s749_s7 = int_to_ptr.vmem [resolvable:$true] %s149_s7 }
  0x33   : > { %s139_s27 = scalar_lea.sflag [#allocation6], %s690_s22  ;;  %s513_s30 = scalar_lea.hbm %s747_s16, 512 }
  0x34   : > { %p514_p3 = scmp.ne.s32.totalorder %s747_s16, %s513_s30  ;;  %s518_s23 = scalar_lea.hbm %s868_s1, 1024 }
  0x35   : > { %p519_p0 = scmp.lt.u32.totalorder %s747_s16, %s868_s1  ;;  %p520_p2 = scmp.lt.u32.totalorder %s518_s23, %s513_s30 }
  0x36   : > { %p516_p8 = pnand %p514_p3, %p485_p1  ;;  %p522_p5 = scmp.lt.u32.totalorder %s513_s30, %s747_s16 }
  0x37   : > { %p521_p4 = por %p520_p2, %p519_p0 }
  0x38   : > { %p517_p10 = pneg %p516_p8 }
  0x39   : > { %p523_p7 = por %p522_p5, %p521_p4 }
  0x3b   : > { %p524_p9 = pnand %p523_p7, %p517_p10 }
  0x3d   : > { %527 = shalt.err (!%p524_p9)
}
  0x3e   : > { %s528_s5 = scalar_lea.vmem %s749_s7, 512  ;;  %s618_s6 = smov [#allocation5]  }
  0x3f   : > { %p529_p11 = scmp.ne.s32.totalorder %s749_s7, %s528_s5  ;;  %s533_s8 = sshll.u32 %s618_s6, 4  ;;  %s534_s8 = int_to_ptr.vmem [resolvable:$false] %s533_s8 }
  0x40   : > { %s535_s14 = scalar_lea.vmem %s534_s8, 1024  ;;  %p536_p6 = scmp.lt.s32.totalorder %s749_s7, %s534_s8 }
  0x41   : > { %p531_p3 = pnand %p529_p11, %p485_p1  ;;  %p537_p0 = scmp.lt.s32.totalorder %s535_s14, %s528_s5 }
  0x43   : > { %p532_p8 = pneg %p531_p3  ;;  %p538_p2 = por %p537_p0, %p536_p6 }
  0x45   : > { %p539_p4 = pnand %p538_p2, %p532_p8 }
  0x47   : > { %542 = shalt.err (!%p539_p4)
}
  0x48   : > { %430 = dma.hbm_to_vmem [thread:$0]  (!%p699_p13), %s747_s16, 512, %s749_s7, %s139_s27, %s616_s25, %s616_s25, %s617_s26  }
  0x49   : > { %161 = sbr.rel (%p739_p12) target bundleno = 303 (0x12f), region = 28  ;;  %s783_s30 = sand.u32 (!%p739_p12), 1, %s605_s10  }
  0x4a   : > { %s417_s3 = smul.u32 (!%p739_p12), 24, %s783_s30  ;;  %s164_s17 = scalar_lea.sflag (!%p739_p12), [#allocation3], %s783_s30 }
  0x4b   : > { %p877_p6 = scmp.ne.s32.totalorder (!%p739_p12), %s872_s19, 0 }
  0x4c   : > { %s787_s28 = scalar_lea.vmem (!%p739_p12), [#allocation2], %s417_s3 }
  0x50   : > { %588 = dma.done.wait (%p877_p6), %s164_s17, 384  }
  0x51   : > { %590 = vsyncadd (%p877_p6), %s164_s17, 4294966912  ;;  %s407_s22 = sshll.u32 %s783_s30, 5  ;;  %s173_s25 = scalar_lea.sflag [#allocation6], %s783_s30 }
  0x52   : > { %s795_s26 = scalar_lea.vmem [#allocation5], %s407_s22 }
  0x53   : > { %592 = dma.done.wait (%p877_p6), %s173_s25, 512  }
  0x54   : > { %594 = vsyncadd (%p877_p6), %s173_s25, 4294966784  ;;  %v228_v0 = vlaneseq  ;;  %v225_v3 = vld [vmem:[%s795_s26 + $0x8] sm:$0xff]  ;;  %v203_v6 = vld [vmem:[%s787_s28 + $0x8] sm:$0xff]  ;;  %s408_s19 = sshll.u32 %s783_s30, 3  ;;  %s411_s4 = sshll.u32 %s656_s13, 7 }
  0x55   : > { %v231_v4 = vmul.f32 %v225_v3, %v225_v3  ;;  %v202_v5 = vld [vmem:[%s787_s28] sm:$0xff]  ;;  %v224_v36 = vld [vmem:[%s795_s26] sm:$0xff]  ;;  %v227_v41 = vld [vmem:[%s795_s26 + $0x18] sm:$0xff]  ;;  %s201_s7 = scalar_lea.vmem [#allocation7], %s408_s19  ;;  %s823_s24 = scalar_lea.hbm %s869_s2, %s411_s4 }
  0x56   : > { %v229_v1 = vshrl.u32 %v228_v0, 7  ;;  %v205_v8 = vsub.f32 %v203_v6, %v202_v5  ;;  %v226_v10 = vld [vmem:[%s795_s26 + $0x10] sm:$0xff]  ;;  %v204_v53 = vld [vmem:[%s787_s28 + $0x10] sm:$0xff]  ;;  %s306_s16 = sshll.u32 %s201_s7, 4  ;;  %s293_s29 = scalar_lea.sflag [#allocation4], %s783_s30  ;;  %s825_s16 = int_to_ptr.vmem [resolvable:$true] %s306_s16 }
  0x57   : > { %v233_v9 = vrot.slane %v231_v4, 1  ;;  %v230_v12 = vsub.f32 %v226_v10, %v225_v3  ;;  %s543_s5 = scalar_lea.vmem %s825_s16, 128  ;;  %p880_p1 = scmp.ne.s32.totalorder %s873_s20, 0 }
  0x58   : > { %vm239_vm0 = vcmp.ge.s32.totalorder %v229_v1, 3  ;;  %vm240_vm1 = vcmp.lt.s32.totalorder %v229_v1, 6  ;;  %v207_v11 = vand.u32 2147483647, %v205_v8  ;;  %v263_v23 = vsub.s32 5, %v229_v1  ;;  %p544_p13 = scmp.ne.s32.totalorder %s825_s16, %s543_s5  ;;  %s619_s13 = smov [#allocation7]  }
  0x59   : > { %vm801_vm2 = vmand %vm239_vm0, %vm240_vm1  ;;  %v235_v13 = vadd.f32 %v233_v9, %v231_v4  ;;  %v248_v16 = vadd.f32 3.1415927, %v230_v12  ;;  %v257_v25 = vsub.s32 3, %v229_v1  ;;  %vm260_vm3 = vcmp.eq.s32.totalorder %v229_v1, 2  ;;  %s547_s6 = sshll.u32 %s619_s13, 4  ;;  %s548_s6 = int_to_ptr.vmem [resolvable:$false] %s547_s6 }
  0x5a   : > { %v243_v7 = vsel %vm801_vm2, %v225_v3, 1.0  ;;  %v208_v14 = vsub.f32 0.0, %v207_v11  ;;  %v242_v17 = vsel %vm801_vm2, %v226_v10, 1.0  ;;  %vm254_vm4 = vcmp.lt.s32.totalorder %v229_v1, 2  ;;  %p545_p12 = pnand %p544_p13, %p880_p1  ;;  %s549_s8 = scalar_lea.vmem %s548_s6, 256 }
  0x5b   : > { %471 = vrcp.f32 %v243_v7  ;;  %v250_v19 = vmul.f32 0.15915494, %v248_v16  ;;  %v278_v40 = vsub.s32 0, %v229_v1  ;;  %v206_v44 = vmax.f32 %v205_v8, 0.0  ;;  %p550_p5 = scmp.lt.s32.totalorder %s825_s16, %s548_s6  ;;  %p551_p7 = scmp.lt.s32.totalorder %s549_s8, %s543_s5 }
  0x5c   : > { %473 = vrcp.f32 %v225_v3  ;;  %v209_v15 = vmul.f32 1.442695, %v208_v14  ;;  %p546_p10 = pneg %p545_p12 }
  0x5d   : > { %475 = vrsqrt.f32 %v235_v13  ;;  %v251_v21 = vfloor.f32 %v250_v19  ;;  %v279_v48 = vrot.slane %v227_v41, %v278_v40  ;;  %p552_p9 = por %p551_p7, %p550_p5 }
  0x5e   : > { %477 = vpow2.f32 %v209_v15 }
  0x5f   : > { %v252_v27 = vmul.f32 6.2831855, %v251_v21  ;;  %p553_p11 = pnand %p552_p9, %p546_p10 }
  0x61   : > { %v253_v31 = vsub.f32 %v230_v12, %v252_v27 }
  0x65   : > { %v472_v18 = vpop.eup %471 }
  0x66   : > { %v245_v20 = vmul.f32 %v472_v18, %v242_v17  ;;  %v474_v22 = vpop.eup %473 }
  0x67   : > { %v476_v24 = vpop.eup %475  ;;  %v264_v29 = vrot.slane %v474_v22, %v263_v23 }
  0x68   : > { %479 = vlog2.f32 %v245_v20  ;;  %v478_v26 = vpop.eup %477  ;;  %v258_v30 = vrot.slane %v476_v24, %v257_v25 }
  0x69   : > { %v211_v28 = vadd.f32 1.0, %v478_v26  ;;  %v265_v33 = vmul.f32 %v264_v29, %v230_v12 }
  0x6a   : > { %v259_v35 = vmul.f32 %v258_v30, %v230_v12 }
  0x6b   : > { %481 = vlog2.f32 %v211_v28 }
  0x72   : > { %v480_v32 = vpop.eup %479 }
  0x73   : > { %v247_v34 = vmul.f32 0.6931472, %v480_v32 }
  0x75   : > { %v266_v37 = vsel %vm801_vm2, %v247_v34, %v253_v31  ;;  %v482_v43 = vpop.eup %481 }
  0x76   : > { %v267_v38 = vsel %vm260_vm3, %v265_v33, %v266_v37  ;;  %v213_v47 = vmul.f32 0.6931472, %v482_v43 }
  0x77   : > { %v268_v39 = vsel %vm254_vm4, %v259_v35, %v267_v38 }
  0x78   : > { %v269_v42 = vsub.f32 %v224_v36, %v268_v39  ;;  %v214_v51 = vadd.f32 %v213_v47, %v206_v44 }
  0x7a   : > { %v270_v45 = vand.u32 2147483647, %v269_v42  ;;  %v272_v46 = vmul.f32 0.5, %v269_v42  ;;  %v215_v55 = vmul.f32 %v214_v51, %v204_v53 }
  0x7c   : > { %vm271_vm5 = vcmp.lt.f32.partialorder %v270_v45, 1.0  ;;  %v273_v49 = vmul.f32 %v272_v46, %v269_v42  ;;  %v409_v50 = vadd.f32 -0.5, %v270_v45 }
  0x7e   : > { %v275_v52 = vsel %vm271_vm5, %v273_v49, %v409_v50 }
  0x7f   : > { %v280_v54 = vmul.f32 %v279_v48, %v275_v52 }
  0x81   : > { %281 = vadd.xlane.f32.xlu0 %v280_v54 }
  0x85   : > { %216 = vadd.xlane.f32.xlu0 %v215_v55 }
 0x10e   : > { %v282_v56 = vpop.xlane.xlu0 %281 }
 0x10f   : > { %v283_v57 = vrot.slane %v282_v56, 4 }
 0x111   : > { %v284_v58 = vadd.f32 %v283_v57, %v282_v56 }
 0x112   : > { %v217_v59 = vpop.xlane.xlu0 %216 }
 0x113   : > { %v285_v60 = vrot.slane %v284_v58, 2  ;;  %v218_v61 = vrot.slane %v217_v59, 4 }
 0x115   : > { %v286_v62 = vadd.f32 %v285_v60, %v284_v58  ;;  %v219_v63 = vadd.f32 %v218_v61, %v217_v59 }
 0x117   : > { %v287_v0 = vrot.slane %v286_v62, 1  ;;  %v220_v1 = vrot.slane %v219_v63, 2 }
 0x119   : > { %v288_v2 = vadd.f32 %v287_v0, %v286_v62  ;;  %v221_v3 = vadd.f32 %v220_v1, %v219_v63 }
 0x11b   : > { %v222_v4 = vrot.slane %v221_v3, 1  ;;  %v289_v5 = vmul.f32 2.0, %v288_v2 }
 0x11d   : > { %v223_v6 = vadd.f32 %v222_v4, %v221_v3 }
 0x11f   : > { %v290_v7 = vadd.f32 %v289_v5, %v223_v6 }
 0x121   : > { %291 = vst [vmem:[%s201_s7] sm:$0xff] %v290_v7 }
 0x122   : > { %556 = shalt.err (!%p553_p11)
}
 0x123   : > { %s557_s14 = scalar_lea.hbm %s823_s24, 128  ;;  %s561_s17 = scalar_lea.hbm %s869_s2, 256 }
 0x124   : > { %p558_p3 = scmp.ne.s32.totalorder %s823_s24, %s557_s14  ;;  %p562_p2 = scmp.lt.u32.totalorder %s823_s24, %s869_s2 }
 0x125   : > { %p563_p4 = scmp.lt.u32.totalorder %s561_s17, %s557_s14  ;;  %p565_p13 = scmp.lt.u32.totalorder %s557_s14, %s823_s24 }
 0x126   : > { %p559_p8 = pnand %p558_p3, %p880_p1 }
 0x127   : > { %p564_p6 = por %p563_p4, %p562_p2 }
 0x128   : > { %p560_p0 = pneg %p559_p8 }
 0x129   : > { %p566_p12 = por %p565_p13, %p564_p6 }
 0x12b   : > { %p567_p10 = pnand %p566_p12, %p560_p0 }
 0x12d   : > { %570 = shalt.err (!%p567_p10)
}
 0x12e   : > { %422 = dma.vmem_to_hbm [thread:$0]  (%p880_p1), %s825_s16, 128, %s823_s24, %s293_s29  }
 0x12f PF: > { %s318_s25 = sand.u32 1, %s601_s9   ;;  %p881_p5 = scmp.ne.s32.totalorder %s874_s21, 0 }
 0x130   : > { %p882_p7 = scmp.ge.s32.totalorder %s613_s12, 2  ;;  %s319_s26 = scalar_lea.sflag [#allocation4], %s318_s25 }
 0x132   : > { %p432_p9 = pnand %p882_p7, %p881_p5 }
 0x134   : > { %596 = dma.done.wait (!%p432_p9), %s319_s26, 128  }
 0x135   : > { %598 = vsyncadd (!%p432_p9), %s319_s26, 4294967168  ;;  %p18_p11 = scmp.ge.s32.totalorder %s660_s15, 4   ;;  %s883_s9 = smov %s605_s10 }
 0x136   : > { %s884_s10 = smov %s609_s11  ;;  %s885_s11 = smov %s672_s18 }
 0x137   : > { %s886_s12 = smov %s660_s15  ;;  %20 = sbr.rel (!%p18_p11) target bundleno = 7 (0x7), region = 86 }
 0x13e   :  { %324 = vsyncpa [#allocation3], 1 }
 0x13f   :  { %326 = vsyncpa [#allocation3 + $0x1], 1 }
 0x140   :  { %327 = vsyncpa [#allocation6], 1 }
 0x141   :  { %329 = vsyncpa [#allocation6 + $0x1], 1 }
 0x142   :  { %330 = vsyncpa [#allocation4], 1 }
 0x143   :  { %332 = vsyncpa [#allocation4 + $0x1], 1 }

</bundles_post_ra>
